<compile_context>
chip_gen: v5e
topology: v5e:2x2
jax: 0.10.0
libtpu: 0.0.40
codegen_flags: <defaults>
</compile_context>

<pallas_src>
import functools

import jax
import jax.numpy as jnp
from jax import lax
from jax.experimental import pallas as pl
from jax.experimental.pallas import tpu as pltpu

_MiB = 1024 * 1024


# ----------------------------- Pallas kernel -------------------------------

def _instance_norm_kernel(x_ref, o_ref, *, epsilon, inv_n, axis):
    """Normalize each instance along `axis` of the VMEM tile.

    Single sweep for the stats (sum, sum of squares, f32), then one fused
    scale+shift pass over x:  out = x * scale - mean * scale.
    """
    x = x_ref[...].astype(jnp.float32)
    s1 = jnp.sum(x, axis=axis, keepdims=True)
    s2 = jnp.sum(x * x, axis=axis, keepdims=True)
    mean = s1 * inv_n
    # E[x^2] - mean^2 can round slightly negative -> clamp before rsqrt.
    var = jnp.maximum(s2 * inv_n - mean * mean, 0.0)
    scale = lax.rsqrt(var + epsilon)          # EUP
    o_ref[...] = (x * scale - mean * scale).astype(o_ref.dtype)


# ----------------------------- tiling helpers -------------------------------

def _round_up(a, m):
    return ((a + m - 1) // m) * m


def _round_down(a, m):
    return (a // m) * m


def _vmem_budget_bytes():
    """(I/O-buffer budget, scoped vmem_limit) sized per TPU generation."""
    try:
        cap = int(pltpu.get_tpu_info().vmem_capacity_bytes)
    except Exception:
        cap = 64 * _MiB  # conservative: v7x physical VMEM per TensorCore
    # Budget for double-buffered I/O tiles + f32 temporaries, with headroom.
    budget = max(cap // 2 - 4 * _MiB, 8 * _MiB)
    vmem_limit = int(min(max(budget + budget // 2, 32 * _MiB), cap - 8 * _MiB))
    return budget, vmem_limit


def _tile_extent(total, hw, itemsize, budget, granule):
    """Pick a tile extent (rows or lanes) along the instance axis."""
    # Per-instance VMEM cost: double-buffered in + out tiles plus ~8 B/elem of
    # in-kernel f32 temporaries (x upcast, x*x).
    per_inst = hw * (2 * itemsize + 2 * itemsize + 8)
    t_max = max(_round_down(budget // max(per_inst, 1), granule), granule)
    # Keep each tile >= ~1 MiB of DMA so per-step overhead stays negligible.
    t_min_dma = _round_up(max(_MiB // max(hw * itemsize, 1), 1), granule)
    # Aim for ~8 grid steps: pipelining overlap + both v7x TensorCores.
    t_target = _round_up(pl.cdiv(total, 8), granule)
    tile = min(max(t_target, t_min_dma), t_max)
    tile = max(_round_down(tile, granule), granule)
    if tile >= total:
        tile = total  # full extent is always a legal block dim
    return tile


# ----------------------------- JAX wrappers ----------------------------------

def _instance_norm_rows(x, epsilon):
    """H*W on lanes (H*W >= 128): one (b, c) instance per row."""
    B, C, H, W = x.shape
    R, HW = B * C, H * W
    x2 = x.reshape(R, HW)
    itemsize = x.dtype.itemsize

    budget, vmem_limit = _vmem_budget_bytes()
    tile_rows = _tile_extent(R, HW, itemsize, budget, granule=8)
    grid = (pl.cdiv(R, tile_rows),)

    kernel = functools.partial(
        _instance_norm_kernel,
        epsilon=float(epsilon), inv_n=1.0 / float(HW), axis=-1)

    out = pl.pallas_call(
        kernel,
        out_shape=jax.ShapeDtypeStruct((R, HW), x.dtype),
        grid=grid,
        in_specs=[pl.BlockSpec((tile_rows, HW), lambda i: (i, 0))],
        out_specs=pl.BlockSpec((tile_rows, HW), lambda i: (i, 0)),
        compiler_params=pltpu.CompilerParams(
            dimension_semantics=("parallel",),
            vmem_limit_bytes=vmem_limit),
    )(x2)
    return out.reshape(B, C, H, W)


def _instance_norm_cols(x, epsilon):
    """Small H*W (< 128): B*C on lanes (dense stores), reduce over sublanes."""
    B, C, H, W = x.shape
    R, HW = B * C, H * W
    x2 = jnp.transpose(x.reshape(R, HW))   # (HW, R): instances on lanes
    itemsize = x.dtype.itemsize

    budget, vmem_limit = _vmem_budget_bytes()
    tile_cols = _tile_extent(R, HW, itemsize, budget, granule=128)
    grid = (pl.cdiv(R, tile_cols),)

    kernel = functools.partial(
        _instance_norm_kernel,
        epsilon=float(epsilon), inv_n=1.0 / float(HW), axis=0)

    out = pl.pallas_call(
        kernel,
        out_shape=jax.ShapeDtypeStruct((HW, R), x.dtype),
        grid=grid,
        in_specs=[pl.BlockSpec((HW, tile_cols), lambda i: (0, i))],
        out_specs=pl.BlockSpec((HW, tile_cols), lambda i: (0, i)),
        compiler_params=pltpu.CompilerParams(
            dimension_semantics=("parallel",),
            vmem_limit_bytes=vmem_limit),
    )(x2)
    return jnp.transpose(out).reshape(B, C, H, W)


def instance_norm(x, epsilon=1e-8):
    """InstanceNorm over dims (2, 3) of an NCHW tensor (matches the module)."""
    _, _, H, W = x.shape
    if H * W >= 128:
        return _instance_norm_rows(x, epsilon)
    return _instance_norm_cols(x, epsilon)


# ----------------------------- reference & test ------------------------------

def instance_norm_ref(x, epsilon=1e-8):
    mean = jnp.mean(x, axis=(2, 3), keepdims=True)
    xc = x - mean
    var = jnp.mean(xc * xc, axis=(2, 3), keepdims=True)
    return xc * lax.rsqrt(var + epsilon)


if __name__ == "__main__":
    key = jax.random.PRNGKey(0)
    B, C, H, W = 2, 4, 16, 16
    x = jax.random.normal(key, (B, C, H, W), dtype=jnp.float32)

    out = jax.jit(instance_norm)(x)
    out = jax.block_until_ready(out)

    ref = instance_norm_ref(x)
    assert out.shape == (B, C, H, W), out.shape
    assert bool(jnp.all(jnp.isfinite(out)))
    assert jnp.allclose(out, ref, atol=1e-5, rtol=1e-5), float(
        jnp.max(jnp.abs(out - ref)))

    # Also exercise the small-spatial (lane = B*C) layout.
    x_small = jax.random.normal(jax.random.PRNGKey(1), (2, 8, 7, 7),
                                dtype=jnp.float32)
    out_small = jax.block_until_ready(jax.jit(instance_norm)(x_small))
    ref_small = instance_norm_ref(x_small)
    assert jnp.allclose(out_small, ref_small, atol=1e-5, rtol=1e-5), float(
        jnp.max(jnp.abs(out_small - ref_small)))

    print("KERNEL_OK")
</pallas_src>

<mosaic_0001>
module attributes {stable_mosaic.version = 11 : i64} {
  func.func @_instance_norm_kernel(%arg0: i32, %arg1: memref<8x256xf32, #tpu.memory_space<vmem>>, %arg2: memref<8x256xf32, #tpu.memory_space<vmem>>) attributes {dimension_semantics = [#tpu.dimension_semantics<parallel>], iteration_bounds = array<i64: 1>, scalar_prefetch = 0 : i64, scratch_operands = 0 : i64, tpu.core_type = #tpu.core_type<tc>, window_params = [{transform_indices = @transform_0, window_bounds = array<i64: 8, 256>}, {transform_indices = @transform_1, window_bounds = array<i64: 8, 256>}]} {
    %c0 = arith.constant 0 : index
    %c0_0 = arith.constant 0 : index
    %0 = vector.load %arg1[%c0, %c0_0] : memref<8x256xf32, #tpu.memory_space<vmem>>, vector<8x256xf32>
    %cst = arith.constant dense<0.000000e+00> : vector<8xf32>
    %1 = vector.multi_reduction <add>, %0, %cst [1] : vector<8x256xf32> to vector<8xf32>
    %2 = vector.shape_cast %1 : vector<8xf32> to vector<8x1xf32>
    %3 = arith.mulf %0, %0 : vector<8x256xf32>
    %cst_1 = arith.constant dense<0.000000e+00> : vector<8xf32>
    %4 = vector.multi_reduction <add>, %3, %cst_1 [1] : vector<8x256xf32> to vector<8xf32>
    %5 = vector.shape_cast %4 : vector<8xf32> to vector<8x1xf32>
    %cst_2 = arith.constant 3.906250e-03 : f32
    %6 = vector.broadcast %cst_2 : f32 to vector<8x1xf32>
    %7 = arith.mulf %2, %6 : vector<8x1xf32>
    %cst_3 = arith.constant 3.906250e-03 : f32
    %8 = vector.broadcast %cst_3 : f32 to vector<8x1xf32>
    %9 = arith.mulf %5, %8 : vector<8x1xf32>
    %10 = arith.mulf %7, %7 : vector<8x1xf32>
    %11 = arith.subf %9, %10 : vector<8x1xf32>
    %cst_4 = arith.constant 0.000000e+00 : f32
    %12 = vector.broadcast %cst_4 : f32 to vector<8x1xf32>
    %13 = arith.maximumf %11, %12 : vector<8x1xf32>
    %cst_5 = arith.constant 9.99999993E-9 : f32
    %14 = vector.broadcast %cst_5 : f32 to vector<8x1xf32>
    %15 = arith.addf %13, %14 : vector<8x1xf32>
    %16 = math.rsqrt %15 : vector<8x1xf32>
    %17 = vector.broadcast %16 : vector<8x1xf32> to vector<8x256xf32>
    %18 = arith.mulf %0, %17 : vector<8x256xf32>
    %19 = arith.mulf %7, %16 : vector<8x1xf32>
    %20 = vector.broadcast %19 : vector<8x1xf32> to vector<8x256xf32>
    %21 = arith.subf %18, %20 : vector<8x256xf32>
    %c0_6 = arith.constant 0 : index
    %c0_7 = arith.constant 0 : index
    %22 = vector.load %arg2[%c0_6, %c0_7] : memref<8x256xf32, #tpu.memory_space<vmem>>, vector<8x256xf32>
    tpu.vector_store %arg2[%c0_6, %c0_7], %21 {strides = array<i32>} : memref<8x256xf32, #tpu.memory_space<vmem>>, vector<8x256xf32>,
    return
  }
  func.func @transform_0(%arg0: i32) -> (i32, i32) {
    %c0_i32 = arith.constant 0 : i32
    %c0_i32_0 = arith.constant 0 : i32
    return %arg0, %c0_i32 : i32, i32
  }
  func.func @transform_1(%arg0: i32) -> (i32, i32) {
    %c0_i32 = arith.constant 0 : i32
    %c0_i32_0 = arith.constant 0 : i32
    return %arg0, %c0_i32 : i32, i32
  }
}

</mosaic_0001>

<bundles_post_ra>
// kernel: instance_norm.1
= control target key start
LH: loop header
LB: loop body
LE: loop exit
PB: predicated region body
PF: predicated region fallthrough
CT: control target
= control target key end

     0   :  { %s69_s0 = inlined_call_operand.vmem [shape: f32[8,256], index: 0, kind: input, shape index: {}]   ;;  %s70_s1 = inlined_call_operand.vmem [shape: f32[8,256], index: 1, kind: output, shape index: {}]  }
   0x1   :  { %v8_v0 = vld [vmem:[%s69_s0] sm:$0xff]  ;;  %v9_v1 = vld [vmem:[%s69_s0 + $0x8] sm:$0xff] }
   0x2   :  { %v10_v2 = vadd.f32 %v9_v1, %v8_v0  ;;  %v13_v3 = vmul.f32 %v8_v0, %v8_v0  ;;  %v14_v4 = vmul.f32 %v9_v1, %v9_v1 }
   0x4   :  { %11 = vadd.xlane.f32.xlu0 %v10_v2  ;;  %v15_v5 = vadd.f32 %v14_v4, %v13_v3 }
   0xc   :  { %16 = vadd.xlane.f32.xlu0 %v15_v5 }
  0x77   :  { %v12_v6 = vpop.xlane.xlu0 %11 }
  0x78   :  { %v18_v7 = vmul.f32 0.00390625, %v12_v6 }
  0x7a   :  { %v20_v9 = vmul.f32 %v18_v7, %v18_v7 }
  0x7f   :  { %v17_v8 = vpop.xlane.xlu0 %16 }
  0x80   :  { %v19_v10 = vmul.f32 0.00390625, %v17_v8 }
  0x82   :  { %v21_v11 = vsub.f32 %v19_v10, %v20_v9 }
  0x84   :  { %v22_v12 = vmax.f32 %v21_v11, 0.0 }
  0x86   :  { %v23_v13 = vadd.f32 1e-08, %v22_v12 }
  0x88   :  { %45 = vrsqrt.f32 %v23_v13  ;;  %vm30_vm1 = vweird.f32 %v23_v13 }
  0x8e   :  { %v46_v14 = vpop.eup %45 }
  0x8f   :  { %v25_v15 = vmul.f32 %v46_v14, %v23_v13  ;;  %vm31_vm0 = vweird.f32 %v46_v14 }
  0x90   :  { %vm32_vm2 = vmor %vm30_vm1, %vm31_vm0 }
  0x91   :  { %v26_v16 = vmul.f32 %v46_v14, %v25_v15 }
  0x93   :  { %v27_v17 = vmul.f32 0.5, %v26_v16 }
  0x95   :  { %v28_v18 = vsub.f32 1.5, %v27_v17 }
  0x97   :  { %v29_v19 = vmul.f32 %v46_v14, %v28_v18 }
  0x99   :  { %v33_v20 = vsel %vm32_vm2, %v46_v14, %v29_v19 }
  0x9a   :  { %v34_v21 = vmul.f32 %v33_v20, %v8_v0  ;;  %v35_v22 = vmul.f32 %v33_v20, %v9_v1  ;;  %v36_v23 = vmul.f32 %v33_v20, %v18_v7 }
  0x9c   :  { %v37_v24 = vsub.f32 %v34_v21, %v36_v23  ;;  %v38_v25 = vsub.f32 %v35_v22, %v36_v23 }
  0x9e   :  { %39 = vst [vmem:[%s70_s1] sm:$0xff] %v37_v24 }
  0x9f   :  { %40 = vst [vmem:[%s70_s1 + $0x8] sm:$0xff] %v38_v25 }

</bundles_post_ra>
